<compile_context>
chip_gen: v7x
topology: tpu7x:2x2x1
jax: 0.10.0
libtpu: 0.0.40
codegen_flags: <defaults>
</compile_context>

<pallas_src>
import functools

import jax
import jax.numpy as jnp
from jax import lax
from jax.experimental import pallas as pl
from jax.experimental.pallas import tpu as pltpu


# --------------------------------------------------------------------------- #
# In-kernel helpers (chunked over 128-lane columns)
# --------------------------------------------------------------------------- #
def _chunked_stats(x_ref, tc, lane_chunks, unroll):
    """One-pass sufficient statistics (sum x, sum x^2) in f32, (tc,1) each."""
    def body(j, carry):
        a1, a2 = carry
        off = pl.multiple_of(j * 128, 128)
        xj = x_ref[:, :, pl.ds(off, 128)].astype(jnp.float32)   # (ns, tc, 128)
        p = jnp.sum(xj, axis=0)                                  # (tc, 128) VPU adds
        q = jnp.sum(xj * xj, axis=0)
        a1 = a1 + jnp.sum(p, axis=-1, keepdims=True)             # one XLU reduce
        a2 = a2 + jnp.sum(q, axis=-1, keepdims=True)
        return a1, a2

    init = (jnp.zeros((tc, 1), jnp.float32), jnp.zeros((tc, 1), jnp.float32))
    return lax.fori_loop(0, lane_chunks, body, init, unroll=unroll)


def _chunked_apply(x_ref, o_ref, scale, shift, lane_chunks, unroll):
    """y = x*scale + shift, written chunk-by-chunk directly into o_ref."""
    def body(j, carry):
        off = pl.multiple_of(j * 128, 128)
        xj = x_ref[:, :, pl.ds(off, 128)].astype(scale.dtype)
        o_ref[:, :, pl.ds(off, 128)] = (xj * scale[None] + shift[None]).astype(o_ref.dtype)
        return carry

    lax.fori_loop(0, lane_chunks, body, 0, unroll=unroll)


# --------------------------------------------------------------------------- #
# Fused single-pass kernel (whole (ns, tc, hw) slab fits the block budget)
# --------------------------------------------------------------------------- #
def _fused_kernel(x_ref, g_ref, b_ref, o_ref, *, eps, inv_n, tc, lane_chunks,
                  unroll, apply_dtype):
    c = pl.program_id(1)

    s1, s2 = _chunked_stats(x_ref, tc, lane_chunks, unroll)
    mean = s1 * inv_n
    var = jnp.maximum(s2 * inv_n - mean * mean, 0.0)      # guard f32 cancellation
    inv_std = lax.rsqrt(var + eps)                        # (tc, 1)

    # gamma/beta are resident (full (C,1) block); slice our channel tile.
    g = g_ref[pl.ds(c * tc, tc), :]
    b = b_ref[pl.ds(c * tc, tc), :]
    scale_f32 = g * inv_std
    shift_f32 = b - mean * scale_f32

    _chunked_apply(x_ref, o_ref, scale_f32.astype(apply_dtype),
                   shift_f32.astype(apply_dtype), lane_chunks, unroll)


# --------------------------------------------------------------------------- #
# Two-kernel fallback (hw tiled as an extra grid axis)
# --------------------------------------------------------------------------- #
def _stats_kernel(x_ref, s1_ref, s2_ref, *, tc, lane_chunks, unroll):
    @pl.when(pl.program_id(2) == 0)
    def _():
        s1_ref[...] = jnp.zeros_like(s1_ref)
        s2_ref[...] = jnp.zeros_like(s2_ref)

    a1, a2 = _chunked_stats(x_ref, tc, lane_chunks, unroll)
    s1_ref[...] += a1
    s2_ref[...] += a2


def _apply_kernel(x_ref, scale_ref, shift_ref, o_ref, *, lane_chunks, unroll,
                  apply_dtype):
    scale = scale_ref[...].astype(apply_dtype)    # (tc, 1)
    shift = shift_ref[...].astype(apply_dtype)
    _chunked_apply(x_ref, o_ref, scale, shift, lane_chunks, unroll)


# --------------------------------------------------------------------------- #
# Host-side configuration helpers
# --------------------------------------------------------------------------- #
def _device_info():
    kind = ""
    try:
        kind = jax.devices()[0].device_kind.lower()
    except Exception:
        pass
    cap = None
    try:
        cap = int(pltpu.get_tpu_info().vmem_capacity_bytes)
    except Exception:
        cap = None
    is_v7 = "v7" in kind
    if cap is None or cap <= 0:
        cap = (64 << 20) if is_v7 else (128 << 20)
    is_v7 = is_v7 or cap <= (64 << 20)
    bf16_valu = ("v6" in kind) or ("v7" in kind)   # v5e has no bf16 VALU
    return cap, is_v7, bf16_valu


def _pick_unroll(n):
    for u in (8, 4, 2):
        if n >= u and n % u == 0:
            return u
    return 1


def _pick_channel_tile(ns, C, hw_p, itemsize, target_bytes, num_splits,
                       min_steps, max_tc=128):
    """Sublane-aligned divisor of C: biggest block under target that still
    leaves >= min_steps grid steps; max_tc bounds (tc,1) stat-carry vregs."""
    sub = {4: 8, 2: 16, 1: 32}.get(itemsize, 8)
    cands = [t for t in range(sub, min(C, max_tc) + 1, sub) if C % t == 0]
    if not cands:
        cands = [C]          # no aligned divisor: full-C tile is layout-exempt
    fitting = [t for t in cands if ns * t * hw_p * itemsize <= target_bytes]
    if not fitting:
        return None          # caller falls back to the hw-split path
    good = [t for t in fitting if num_splits * (C // t) >= min_steps]
    return max(good) if good else min(fitting)


def _vmem_limit(block_bytes, usable_vmem):
    return int(min(max(6 * block_bytes + (4 << 20), 16 << 20), usable_vmem))


# --------------------------------------------------------------------------- #
# pallas_call wrappers
# --------------------------------------------------------------------------- #
def _fused_call(xr, g2, b2, *, tc, eps, inv_n, apply_dtype, usable_vmem):
    num_splits, ns, C, hw_p = xr.shape
    itemsize = jnp.dtype(xr.dtype).itemsize
    lane_chunks = hw_p // 128
    unroll = _pick_unroll(lane_chunks)
    block_bytes = ns * tc * hw_p * itemsize

    kernel = functools.partial(_fused_kernel, eps=eps, inv_n=inv_n, tc=tc,
                               lane_chunks=lane_chunks, unroll=unroll,
                               apply_dtype=apply_dtype)
    return pl.pallas_call(
        kernel,
        out_shape=jax.ShapeDtypeStruct(xr.shape, xr.dtype),
        grid_spec=pltpu.PrefetchScalarGridSpec(
            num_scalar_prefetch=0,
            grid=(num_splits, C // tc),
            in_specs=[
                pl.BlockSpec((pl.Squeezed(), ns, tc, hw_p), lambda s, c: (s, 0, c, 0)),
                pl.BlockSpec((C, 1), lambda s, c: (0, 0)),   # gamma resident
                pl.BlockSpec((C, 1), lambda s, c: (0, 0)),   # beta resident
            ],
            out_specs=pl.BlockSpec((pl.Squeezed(), ns, tc, hw_p),
                                   lambda s, c: (s, 0, c, 0)),
        ),
        compiler_params=pltpu.CompilerParams(
            dimension_semantics=("parallel", "parallel"),
            vmem_limit_bytes=_vmem_limit(block_bytes, usable_vmem),
        ),
    )(xr, g2, b2)


def _split_call(xr, g2, b2, *, tc, eps, inv_n, apply_dtype, usable_vmem,
                target_bytes):
    """Fallback when one (ns, tc, hw) slab does not fit: tile hw as a grid axis.
    Kernel 1 accumulates per-(split,channel) sums; scale/shift are finalized in
    plain JAX (tiny); kernel 2 applies them."""
    num_splits, ns, C, hw_p = xr.shape
    itemsize = jnp.dtype(xr.dtype).itemsize
    n_lane = hw_p // 128

    d = 1
    for cand in range(n_lane, 0, -1):
        if n_lane % cand == 0 and ns * tc * 128 * cand * itemsize <= target_bytes:
            d = cand
            break
    # TODO(synk): if even hwt=128 with the minimal tc overflows VMEM (huge ns),
    # an additional ns split would be needed.
    hwt = 128 * d
    n_hwt = n_lane // d
    lane_chunks = d
    unroll = _pick_unroll(lane_chunks)
    block_bytes = ns * tc * hwt * itemsize
    vmem_limit = _vmem_limit(block_bytes, usable_vmem)
    n_ct = C // tc

    # ---- pass 1: sufficient statistics (accumulated over the hw axis) -------
    s_shape = jax.ShapeDtypeStruct((num_splits, C, 1), jnp.float32)
    stats_kernel = functools.partial(_stats_kernel, tc=tc,
                                     lane_chunks=lane_chunks, unroll=unroll)
    s1, s2 = pl.pallas_call(
        stats_kernel,
        out_shape=(s_shape, s_shape),
        grid_spec=pltpu.PrefetchScalarGridSpec(
            num_scalar_prefetch=0,
            grid=(num_splits, n_ct, n_hwt),
            in_specs=[pl.BlockSpec((pl.Squeezed(), ns, tc, hwt),
                                   lambda s, c, h: (s, 0, c, h))],
            out_specs=(pl.BlockSpec((pl.Squeezed(), tc, 1), lambda s, c, h: (s, c, 0)),
                       pl.BlockSpec((pl.Squeezed(), tc, 1), lambda s, c, h: (s, c, 0))),
        ),
        compiler_params=pltpu.CompilerParams(
            dimension_semantics=("parallel", "parallel", "arbitrary"),
            vmem_limit_bytes=vmem_limit,
        ),
    )(xr)

    mean = s1 * inv_n
    var = jnp.maximum(s2 * inv_n - mean * mean, 0.0)
    inv_std = lax.rsqrt(var + eps)
    scale = g2[None] * inv_std                    # (num_splits, C, 1) f32
    shift = b2[None] - mean * scale

    # ---- pass 2: apply ------------------------------------------------------
    apply_kernel = functools.partial(_apply_kernel, lane_chunks=lane_chunks,
                                     unroll=unroll, apply_dtype=apply_dtype)
    return pl.pallas_call(
        apply_kernel,
        out_shape=jax.ShapeDtypeStruct(xr.shape, xr.dtype),
        grid_spec=pltpu.PrefetchScalarGridSpec(
            num_scalar_prefetch=0,
            grid=(num_splits, n_ct, n_hwt),
            in_specs=[
                pl.BlockSpec((pl.Squeezed(), ns, tc, hwt), lambda s, c, h: (s, 0, c, h)),
                pl.BlockSpec((pl.Squeezed(), tc, 1), lambda s, c, h: (s, c, 0)),
                pl.BlockSpec((pl.Squeezed(), tc, 1), lambda s, c, h: (s, c, 0)),
            ],
            out_specs=pl.BlockSpec((pl.Squeezed(), ns, tc, hwt),
                                   lambda s, c, h: (s, 0, c, h)),
        ),
        compiler_params=pltpu.CompilerParams(
            dimension_semantics=("parallel", "parallel", "parallel"),
            vmem_limit_bytes=vmem_limit,
        ),
    )(xr, scale, shift)


# --------------------------------------------------------------------------- #
# Public forward
# --------------------------------------------------------------------------- #
def dial_batchnorm2d(x, gamma, beta, *, training=True, training_mode="dual",
                     eps=1e-5, channel_tile=None, max_block_bytes=None):
    """Forward of DIALBatchNorm2d. x is NCHW."""
    N, C, H, W = x.shape
    if training and training_mode in ("dual", "triple"):
        num_splits = 2 if training_mode == "dual" else 3
    else:
        num_splits = 1
        # TODO(synk): eval path of nn.BatchNorm2d uses running_mean/running_var
        # (and training updates them with momentum); those buffer side-effects
        # are not modeled here — batch statistics are always used.
    assert N % num_splits == 0, "batch must be divisible by number of splits"
    ns = N // num_splits
    hw = H * W
    itemsize = jnp.dtype(x.dtype).itemsize

    vmem_cap, is_v7, bf16_valu = _device_info()
    usable_vmem = int(vmem_cap * 3 // 4)                    # ~48 MiB v7x, ~96 MiB v5e/v6e
    gen_target = (6 << 20) if is_v7 else (12 << 20)
    target_bytes = min(gen_target, (usable_vmem - (4 << 20)) // 6)
    if max_block_bytes is not None:
        target_bytes = int(max_block_bytes)
    min_steps = 16 if is_v7 else 8

    # Lane-dense layout: pad hw up to a multiple of 128.  Zeros are stats-safe
    # because inv_n uses the true hw; the pad is dropped on output.
    hw_p = hw if hw % 128 == 0 else ((hw + 127) // 128) * 128
    inv_n = 1.0 / float(ns * hw)

    apply_dtype = (jnp.bfloat16
                   if (jnp.dtype(x.dtype) == jnp.bfloat16 and bf16_valu)
                   else jnp.float32)

    xr = x.reshape(num_splits, ns, C, hw)
    if hw_p != hw:
        xr = jnp.pad(xr, ((0, 0), (0, 0), (0, 0), (0, hw_p - hw)))
    g2 = gamma.reshape(C, 1).astype(jnp.float32)
    b2 = beta.reshape(C, 1).astype(jnp.float32)

    if channel_tile is not None:
        tc = int(channel_tile)
        assert C % tc == 0, "channel_tile must divide C"
        fused = ns * tc * hw_p * itemsize <= target_bytes
    else:
        tc = _pick_channel_tile(ns, C, hw_p, itemsize, target_bytes,
                                num_splits, min_steps)
        fused = tc is not None

    if fused:
        out = _fused_call(xr, g2, b2, tc=tc, eps=eps, inv_n=inv_n,
                          apply_dtype=apply_dtype, usable_vmem=usable_vmem)
    else:
        if channel_tile is None:
            tc = _pick_channel_tile(ns, C, hw_p, itemsize, float("inf"),
                                    num_splits, min_steps)  # smallest-ish legal tile
            tc = min(tc, C)
        out = _split_call(xr, g2, b2, tc=tc, eps=eps, inv_n=inv_n,
                          apply_dtype=apply_dtype, usable_vmem=usable_vmem,
                          target_bytes=target_bytes)

    if hw_p != hw:
        out = out[..., :hw]
    return out.reshape(N, C, H, W)


# --------------------------------------------------------------------------- #
# Pure-JAX reference and tests
# --------------------------------------------------------------------------- #
def _reference(x, gamma, beta, num_splits, eps=1e-5):
    chunks = jnp.split(x, num_splits, axis=0)
    outs = []
    for xi in chunks:
        mean = xi.mean(axis=(0, 2, 3), keepdims=True)
        var = ((xi - mean) ** 2).mean(axis=(0, 2, 3), keepdims=True)
        outs.append((xi - mean) / jnp.sqrt(var + eps))
    y = jnp.concatenate(outs, axis=0)
    return y * gamma[None, :, None, None] + beta[None, :, None, None]


if __name__ == "__main__":
    key = jax.random.PRNGKey(0)
    N, C, H, W = 4, 16, 16, 16  # batch divisible by 2 for 'dual' mode

    x = jax.random.normal(key, (N, C, H, W), dtype=jnp.float32)
    gamma = 1.0 + 0.1 * jnp.arange(C, dtype=jnp.float32)
    beta = 0.05 * jnp.arange(C, dtype=jnp.float32)
    ref = _reference(x, gamma, beta, num_splits=2)

    # 1) auto-tiled fused path
    out = dial_batchnorm2d(x, gamma, beta, training=True, training_mode="dual")
    out = jax.block_until_ready(out)
    assert out.shape == (N, C, H, W)
    assert jnp.allclose(out, ref, atol=1e-4, rtol=1e-4), "mismatch (auto tile)"

    # 2) explicit channel tile (multi-channel-tile fused grid)
    out2 = dial_batchnorm2d(x, gamma, beta, training=True, training_mode="dual",
                            channel_tile=8)
    out2 = jax.block_until_ready(out2)
    assert jnp.allclose(out2, ref, atol=1e-4, rtol=1e-4), "mismatch (tiled C)"

    # 3) force the hw-split (stats + apply) fallback path
    out3 = dial_batchnorm2d(x, gamma, beta, training=True, training_mode="dual",
                            max_block_bytes=8 * 1024)
    out3 = jax.block_until_ready(out3)
    assert jnp.allclose(out3, ref, atol=1e-4, rtol=1e-4), "mismatch (hw split)"

    # 4) non-128-multiple spatial size exercises the lane-dense padding path
    xs = jax.random.normal(jax.random.PRNGKey(1), (N, C, 7, 7), dtype=jnp.float32)
    refs = _reference(xs, gamma, beta, num_splits=2)
    out4 = dial_batchnorm2d(xs, gamma, beta, training=True, training_mode="dual")
    out4 = jax.block_until_ready(out4)
    assert jnp.allclose(out4, refs, atol=1e-4, rtol=1e-4), "mismatch (padded hw)"

    # 5) bf16 input (bf16 apply pass on v6e/v7x, f32 on v5e)
    xb = x.astype(jnp.bfloat16)
    refb = _reference(xb.astype(jnp.float32), gamma, beta, num_splits=2)
    out5 = dial_batchnorm2d(xb, gamma, beta, training=True, training_mode="dual")
    out5 = jax.block_until_ready(out5)
    assert jnp.allclose(out5.astype(jnp.float32), refb, atol=1e-1, rtol=1e-1), \
        "mismatch (bf16)"

    print("KERNEL_OK")
</pallas_src>

<mosaic_0001>
module attributes {stable_mosaic.version = 11 : i64} {
  func.func @_fused_kernel(%arg0: i32, %arg1: i32, %arg2: memref<1x2x8x256xf32, #tpu.memory_space<vmem>>, %arg3: memref<16x1xf32, #tpu.memory_space<vmem>>, %arg4: memref<16x1xf32, #tpu.memory_space<vmem>>, %arg5: memref<1x2x8x256xf32, #tpu.memory_space<vmem>>) attributes {dimension_semantics = [#tpu.dimension_semantics<parallel>, #tpu.dimension_semantics<parallel>], iteration_bounds = array<i64: 2, 2>, scalar_prefetch = 0 : i64, scratch_operands = 0 : i64, tpu.core_type = #tpu.core_type<tc>, window_params = [{transform_indices = @transform_0, window_bounds = array<i64: 1, 2, 8, 256>}, {pipeline_mode = #tpu.pipeline_mode<synchronous>, transform_indices = @transform_1, window_bounds = array<i64: 16, 1>}, {pipeline_mode = #tpu.pipeline_mode<synchronous>, transform_indices = @transform_2, window_bounds = array<i64: 16, 1>}, {transform_indices = @transform_3, window_bounds = array<i64: 1, 2, 8, 256>}]} {
    %cst = arith.constant 0.000000e+00 : f32
    %0 = vector.broadcast %cst : f32 to vector<8x1xf32>
    %cst_0 = arith.constant 0.000000e+00 : f32
    %1 = vector.broadcast %cst_0 : f32 to vector<8x1xf32>
    %c0_i32 = arith.constant 0 : i32
    %c128_i32 = arith.constant 128 : i32
    %2 = arith.muli %c0_i32, %c128_i32 : i32
    %3 = tpu.assume_multiple %2, 128 : i32
    %c0 = arith.constant 0 : index
    %c0_1 = arith.constant 0 : index
    %c0_2 = arith.constant 0 : index
    %4 = arith.index_cast %3 : i32 to index
    %5 = vector.load %arg2[%c0, %c0_1, %c0_2, %4] : memref<1x2x8x256xf32, #tpu.memory_space<vmem>>, vector<1x2x8x128xf32>
    %6 = vector.shape_cast %5 : vector<1x2x8x128xf32> to vector<2x8x128xf32>
    %cst_3 = arith.constant dense<0.000000e+00> : vector<8x128xf32>
    %7 = vector.multi_reduction <add>, %6, %cst_3 [0] : vector<2x8x128xf32> to vector<8x128xf32>
    %8 = arith.mulf %6, %6 : vector<2x8x128xf32>
    %cst_4 = arith.constant dense<0.000000e+00> : vector<8x128xf32>
    %9 = vector.multi_reduction <add>, %8, %cst_4 [0] : vector<2x8x128xf32> to vector<8x128xf32>
    %cst_5 = arith.constant dense<0.000000e+00> : vector<8xf32>
    %10 = vector.multi_reduction <add>, %7, %cst_5 [1] : vector<8x128xf32> to vector<8xf32>
    %11 = vector.shape_cast %10 : vector<8xf32> to vector<8x1xf32>
    %12 = arith.addf %0, %11 : vector<8x1xf32>
    %cst_6 = arith.constant dense<0.000000e+00> : vector<8xf32>
    %13 = vector.multi_reduction <add>, %9, %cst_6 [1] : vector<8x128xf32> to vector<8xf32>
    %14 = vector.shape_cast %13 : vector<8xf32> to vector<8x1xf32>
    %15 = arith.addf %1, %14 : vector<8x1xf32>
    %c1_i32 = arith.constant 1 : i32
    %c128_i32_7 = arith.constant 128 : i32
    %16 = arith.muli %c1_i32, %c128_i32_7 : i32
    %17 = tpu.assume_multiple %16, 128 : i32
    %c0_8 = arith.constant 0 : index
    %c0_9 = arith.constant 0 : index
    %c0_10 = arith.constant 0 : index
    %18 = arith.index_cast %17 : i32 to index
    %19 = vector.load %arg2[%c0_8, %c0_9, %c0_10, %18] : memref<1x2x8x256xf32, #tpu.memory_space<vmem>>, vector<1x2x8x128xf32>
    %20 = vector.shape_cast %19 : vector<1x2x8x128xf32> to vector<2x8x128xf32>
    %cst_11 = arith.constant dense<0.000000e+00> : vector<8x128xf32>
    %21 = vector.multi_reduction <add>, %20, %cst_11 [0] : vector<2x8x128xf32> to vector<8x128xf32>
    %22 = arith.mulf %20, %20 : vector<2x8x128xf32>
    %cst_12 = arith.constant dense<0.000000e+00> : vector<8x128xf32>
    %23 = vector.multi_reduction <add>, %22, %cst_12 [0] : vector<2x8x128xf32> to vector<8x128xf32>
    %cst_13 = arith.constant dense<0.000000e+00> : vector<8xf32>
    %24 = vector.multi_reduction <add>, %21, %cst_13 [1] : vector<8x128xf32> to vector<8xf32>
    %25 = vector.shape_cast %24 : vector<8xf32> to vector<8x1xf32>
    %26 = arith.addf %12, %25 : vector<8x1xf32>
    %cst_14 = arith.constant dense<0.000000e+00> : vector<8xf32>
    %27 = vector.multi_reduction <add>, %23, %cst_14 [1] : vector<8x128xf32> to vector<8xf32>
    %28 = vector.shape_cast %27 : vector<8xf32> to vector<8x1xf32>
    %29 = arith.addf %15, %28 : vector<8x1xf32>
    %c2_i32 = arith.constant 2 : i32
    %cst_15 = arith.constant 0.001953125 : f32
    %30 = vector.broadcast %cst_15 : f32 to vector<8x1xf32>
    %31 = arith.mulf %26, %30 : vector<8x1xf32>
    %cst_16 = arith.constant 0.001953125 : f32
    %32 = vector.broadcast %cst_16 : f32 to vector<8x1xf32>
    %33 = arith.mulf %29, %32 : vector<8x1xf32>
    %34 = arith.mulf %31, %31 : vector<8x1xf32>
    %35 = arith.subf %33, %34 : vector<8x1xf32>
    %cst_17 = arith.constant 0.000000e+00 : f32
    %36 = vector.broadcast %cst_17 : f32 to vector<8x1xf32>
    %37 = arith.maximumf %35, %36 : vector<8x1xf32>
    %cst_18 = arith.constant 9.99999974E-6 : f32
    %38 = vector.broadcast %cst_18 : f32 to vector<8x1xf32>
    %39 = arith.addf %37, %38 : vector<8x1xf32>
    %40 = math.rsqrt %39 : vector<8x1xf32>
    %c8_i32 = arith.constant 8 : i32
    %41 = arith.muli %arg1, %c8_i32 : i32
    %42 = arith.index_cast %41 : i32 to index
    %c0_19 = arith.constant 0 : index
    %43 = vector.load %arg3[%42, %c0_19] : memref<16x1xf32, #tpu.memory_space<vmem>>, vector<8x1xf32>
    %c8_i32_20 = arith.constant 8 : i32
    %44 = arith.muli %arg1, %c8_i32_20 : i32
    %45 = arith.index_cast %44 : i32 to index
    %c0_21 = arith.constant 0 : index
    %46 = vector.load %arg4[%45, %c0_21] : memref<16x1xf32, #tpu.memory_space<vmem>>, vector<8x1xf32>
    %47 = arith.mulf %43, %40 : vector<8x1xf32>
    %48 = arith.mulf %31, %47 : vector<8x1xf32>
    %49 = arith.subf %46, %48 : vector<8x1xf32>
    %c0_i32_22 = arith.constant 0 : i32
    %c128_i32_23 = arith.constant 128 : i32
    %50 = arith.muli %c0_i32_22, %c128_i32_23 : i32
    %51 = tpu.assume_multiple %50, 128 : i32
    %c0_24 = arith.constant 0 : index
    %c0_25 = arith.constant 0 : index
    %c0_26 = arith.constant 0 : index
    %52 = arith.index_cast %51 : i32 to index
    %53 = vector.load %arg2[%c0_24, %c0_25, %c0_26, %52] : memref<1x2x8x256xf32, #tpu.memory_space<vmem>>, vector<1x2x8x128xf32>
    %54 = vector.shape_cast %53 : vector<1x2x8x128xf32> to vector<2x8x128xf32>
    %55 = vector.shape_cast %47 : vector<8x1xf32> to vector<1x8x1xf32>
    %56 = vector.broadcast %55 : vector<1x8x1xf32> to vector<2x8x128xf32>
    %57 = arith.mulf %54, %56 : vector<2x8x128xf32>
    %58 = vector.shape_cast %49 : vector<8x1xf32> to vector<1x8x1xf32>
    %59 = vector.broadcast %58 : vector<1x8x1xf32> to vector<2x8x128xf32>
    %60 = arith.addf %57, %59 : vector<2x8x128xf32>
    %c0_27 = arith.constant 0 : index
    %c0_28 = arith.constant 0 : index
    %c0_29 = arith.constant 0 : index
    %61 = arith.index_cast %51 : i32 to index
    %62 = vector.load %arg5[%c0_27, %c0_28, %c0_29, %61] : memref<1x2x8x256xf32, #tpu.memory_space<vmem>>, vector<1x2x8x128xf32>
    %63 = vector.shape_cast %62 : vector<1x2x8x128xf32> to vector<2x8x128xf32>
    %64 = vector.shape_cast %60 : vector<2x8x128xf32> to vector<1x2x8x128xf32>
    tpu.vector_store %arg5[%c0_27, %c0_28, %c0_29, %61], %64 {strides = array<i32>} : memref<1x2x8x256xf32, #tpu.memory_space<vmem>>, vector<1x2x8x128xf32>,
    %c1_i32_30 = arith.constant 1 : i32
    %c128_i32_31 = arith.constant 128 : i32
    %65 = arith.muli %c1_i32_30, %c128_i32_31 : i32
    %66 = tpu.assume_multiple %65, 128 : i32
    %c0_32 = arith.constant 0 : index
    %c0_33 = arith.constant 0 : index
    %c0_34 = arith.constant 0 : index
    %67 = arith.index_cast %66 : i32 to index
    %68 = vector.load %arg2[%c0_32, %c0_33, %c0_34, %67] : memref<1x2x8x256xf32, #tpu.memory_space<vmem>>, vector<1x2x8x128xf32>
    %69 = vector.shape_cast %68 : vector<1x2x8x128xf32> to vector<2x8x128xf32>
    %70 = vector.shape_cast %47 : vector<8x1xf32> to vector<1x8x1xf32>
    %71 = vector.broadcast %70 : vector<1x8x1xf32> to vector<2x8x128xf32>
    %72 = arith.mulf %69, %71 : vector<2x8x128xf32>
    %73 = vector.shape_cast %49 : vector<8x1xf32> to vector<1x8x1xf32>
    %74 = vector.broadcast %73 : vector<1x8x1xf32> to vector<2x8x128xf32>
    %75 = arith.addf %72, %74 : vector<2x8x128xf32>
    %c0_35 = arith.constant 0 : index
    %c0_36 = arith.constant 0 : index
    %c0_37 = arith.constant 0 : index
    %76 = arith.index_cast %66 : i32 to index
    %77 = vector.load %arg5[%c0_35, %c0_36, %c0_37, %76] : memref<1x2x8x256xf32, #tpu.memory_space<vmem>>, vector<1x2x8x128xf32>
    %78 = vector.shape_cast %77 : vector<1x2x8x128xf32> to vector<2x8x128xf32>
    %79 = vector.shape_cast %75 : vector<2x8x128xf32> to vector<1x2x8x128xf32>
    tpu.vector_store %arg5[%c0_35, %c0_36, %c0_37, %76], %79 {strides = array<i32>} : memref<1x2x8x256xf32, #tpu.memory_space<vmem>>, vector<1x2x8x128xf32>,
    %c2_i32_38 = arith.constant 2 : i32
    return
  }
  func.func @transform_0(%arg0: i32, %arg1: i32) -> (i32, i32, i32, i32) {
    %c0_i32 = arith.constant 0 : i32
    %c0_i32_0 = arith.constant 0 : i32
    %c0_i32_1 = arith.constant 0 : i32
    return %arg0, %c0_i32, %arg1, %c0_i32_0 : i32, i32, i32, i32
  }
  func.func @transform_1(%arg0: i32, %arg1: i32) -> (i32, i32) {
    %c0_i32 = arith.constant 0 : i32
    %c0_i32_0 = arith.constant 0 : i32
    %c0_i32_1 = arith.constant 0 : i32
    return %c0_i32, %c0_i32_0 : i32, i32
  }
  func.func @transform_2(%arg0: i32, %arg1: i32) -> (i32, i32) {
    %c0_i32 = arith.constant 0 : i32
    %c0_i32_0 = arith.constant 0 : i32
    %c0_i32_1 = arith.constant 0 : i32
    return %c0_i32, %c0_i32_0 : i32, i32
  }
  func.func @transform_3(%arg0: i32, %arg1: i32) -> (i32, i32, i32, i32) {
    %c0_i32 = arith.constant 0 : i32
    %c0_i32_0 = arith.constant 0 : i32
    %c0_i32_1 = arith.constant 0 : i32
    return %arg0, %c0_i32, %arg1, %c0_i32_0 : i32, i32, i32, i32
  }
}

</mosaic_0001>

<bundles_post_ra>
// kernel: tpu_custom_call.1
= control target key start
LH: loop header
LB: loop body
LE: loop exit
PB: predicated region body
PF: predicated region fallthrough
CT: control target
= control target key end

     0   :  { %8 = vsyncpa [#allocation3], 0  ;;  %s862_s0 = inlined_call_operand.hbm [shape: f32[2,2,16,256], index: 0, kind: input, shape index: {}]   ;;  %s863_s1 = inlined_call_operand.vmem [shape: f32[16,1], index: 1, kind: input, shape index: {}]   ;;  %s864_s2 = inlined_call_operand.vmem [shape: f32[16,1], index: 2, kind: input, shape index: {}]   ;;  %s865_s3 = inlined_call_operand.hbm [shape: f32[2,2,16,256], index: 3, kind: output, shape index: {}]  }
   0x1   :  { %10 = vsyncpa [#allocation3 + $0x1], 0 }
   0x2   :  { %11 = vsyncpa [#allocation4], 0 }
   0x3   :  { %13 = vsyncpa [#allocation4 + $0x1], 0  ;;  %s654_s12 = smov 0   ;;  %s656_s13 = smov 0  }
   0x4   :  { %s658_s14 = smov 0   ;;  %s660_s15 = smov 0  }
   0x5   :  { %s662_s16 = smov 0   ;;  %s664_s17 = smov 0  }
   0x6   :  { %s666_s18 = smov 0   ;;  %s668_s19 = smov 0  }
   0x7 LB: > { %s382_s20 = sadd.s32 4294967295, %s623_s19   ;;  %s383_s21 = sadd.s32 4294967294, %s623_s19   ;;  %s623_s19 = sphi %s668_s19, %s19_s19   ;;  %s619_s18 = sphi %s666_s18, %s881_s18   ;;  %s615_s17 = sphi %s664_s17, %s880_s17   ;;  %s611_s16 = sphi %s662_s16, %s879_s16   ;;  %s607_s15 = sphi %s660_s15, %s878_s15   ;;  %s603_s14 = sphi %s658_s14, %s877_s14   ;;  %s599_s13 = sphi %s656_s13, %s876_s13   ;;  %s595_s12 = sphi %s654_s12, %s875_s12  }
   0x8   : > { %s28_s22 = sadd.s32 1, %s615_s17  ;;  %s31_s23 = sadd.s32 1, %s619_s18 }
   0x9   : > { %p29_p0 = scmp.ge.s32.totalorder %s28_s22, 2  ;;  %s40_s24 = sadd.s32 1, %s603_s14 }
   0xa   : > { %p47_p1 = scmp.ne.s32.totalorder %s603_s14, %s599_s13  ;;  %p48_p2 = scmp.eq.s32.totalorder %s623_s19, 0 }
   0xb   : > { %s883_s22 = smov (%p29_p0, %s28_s22), 0  ;;  %s885_s23 = smov (!%p29_p0, %s31_s23), %s619_s18 }
   0xc   : > { %s36_s25 = ssub.s32 %s615_s17, %s883_s22  ;;  %p707_p3 = por %p48_p2, %p47_p1 }
   0xd   : > { %p33_p4 = scmp.ge.s32.totalorder %s885_s23, 2  ;;  %p53_p5 = scmp.ne.s32.totalorder %s599_s13, %s595_s12 }
   0xe   : > { %p54_p6 = scmp.eq.s32.totalorder %s382_s20, 0  ;;  %p121_p7 = scmp.eq.s32.totalorder %s382_s20, 3 }
   0xf   : > { %s887_s23 = smov (%p33_p4, %s885_s23), 0  ;;  %p127_p10 = scmp.eq.s32.totalorder %s383_s21, 3 }
  0x10   : > { %p715_p8 = por %p54_p6, %p53_p5  ;;  %p719_p9 = por %p121_p7, %p47_p1 }
  0x11   : > { %s35_s29 = ssub.s32 %s619_s18, %s887_s23  ;;  %p725_p12 = por %p127_p10, %p53_p5 }
  0x12   : > { %s869_s28 = scalar_select %p719_p9, 1, 0 }
  0x13   : > { %s37_s30 = sor.u32 %s36_s25, %s35_s29  ;;  %p418_p13 = scmp.lt.s32.totalorder %s623_s19, 4 }
  0x14   : > { %p38_p11 = scmp.eq.s32.totalorder %s37_s30, 0  ;;  %s153_s5 = sand.u32 1, %s603_s14  }
  0x15   : > { %s870_s4 = scalar_select %p725_p12, 1, 0 }
  0x16   : > { %s732_s6 = scalar_select %p38_p11, %s603_s14, %s40_s24  }
  0x17   : > { %s386_s7 = sshll.u32 %s153_s5, 5  ;;  %s387_s8 = sshll.u32 %s615_s17, 1 }
  0x18   : > { %s388_s9 = sshll.u32 %s619_s18, 3  ;;  %s157_s10 = scalar_lea.vmem [#allocation2], %s386_s7 }
  0x19   : > { %s166_s11 = sshll.u32 %s157_s10, 4  ;;  %s163_s20 = sadd.s32 %s388_s9, %s387_s8  ;;  %s736_s11 = int_to_ptr.vmem [resolvable:$true] %s166_s11 }
  0x1a   : > { %s389_s21 = sshll.u32 %s163_s20, 7  ;;  %p740_p0 = pnand %p418_p13, %p707_p3 }
  0x1b   : > { %s747_s24 = scalar_lea.hbm %s862_s0, %s389_s21  ;;  %s750_s7 = scalar_lea.sflag [#allocation3], %s153_s5 }
  0x1c   : > { %s495_s8 = scalar_lea.hbm %s747_s24, 512  ;;  %p497_p3 = pneg %p740_p0 }
  0x1d   : > { %p496_p2 = scmp.ne.s32.totalorder %s747_s24, %s495_s8  ;;  %s500_s10 = scalar_lea.hbm %s862_s0, 2048 }
  0x1e   : > { %p501_p6 = scmp.lt.u32.totalorder %s747_s24, %s862_s0  ;;  %p502_p7 = scmp.lt.u32.totalorder %s500_s10, %s495_s8 }
  0x1f   : > { %p498_p4 = pnand %p497_p3, %p496_p2  ;;  %p504_p11 = scmp.lt.u32.totalorder %s495_s8, %s747_s24 }
  0x20   : > { %p503_p10 = por %p502_p7, %p501_p6 }
  0x21   : > { %p499_p5 = pneg %p498_p4 }
  0x22   : > { %p505_p13 = por %p504_p11, %p503_p10 }
  0x24   : > { %p506_p1 = pnand %p505_p13, %p499_p5 }
  0x26   : > { %509 = shalt.err (!%p506_p1)
}
  0x27   : > { %s510_s5 = scalar_lea.vmem %s736_s11, 512  ;;  %s625_s29 = smov [#allocation2]  }
  0x28   : > { %p511_p2 = scmp.ne.s32.totalorder %s736_s11, %s510_s5  ;;  %s515_s30 = sshll.u32 %s625_s29, 4  ;;  %s516_s30 = int_to_ptr.vmem [resolvable:$false] %s515_s30 }
  0x29   : > { %s517_s26 = scalar_lea.vmem %s516_s30, 1024  ;;  %p518_p9 = scmp.lt.s32.totalorder %s736_s11, %s516_s30 }
  0x2a   : > { %p513_p4 = pnand %p511_p2, %p497_p3  ;;  %p519_p6 = scmp.lt.s32.totalorder %s517_s26, %s510_s5 }
  0x2c   : > { %p514_p12 = pneg %p513_p4  ;;  %p520_p7 = por %p519_p6, %p518_p9 }
  0x2e   : > { %p521_p10 = pnand %p520_p7, %p514_p12 }
  0x30   : > { %524 = shalt.err (!%p521_p10)
}
  0x31   : > { %s626_s8 = smov 512   ;;  %s627_s9 = smov 256  }
  0x32   : > { %s628_s10 = smov 16   ;;  %p174_p1 = scmp.lt.s32.totalorder %s623_s19, 5 }
  0x33   : > { %413 = dma.hbm_to_vmem [thread:$0]  (!%p740_p0), %s747_s24, 512, %s736_s11, %s750_s7, %s626_s8, %s627_s9, %s628_s10  }
  0x34   : > { %p872_p3 = scmp.ge.s32.totalorder %s623_s19, 1 }
  0x36   : > { %p175_p5 = pnand %p872_p3, %p174_p1 }
  0x37   : > { %s782_s20 = sand.u32 (!%p175_p5), 1, %s599_s13  }
  0x38   : > { %178 = sbr.rel (%p175_p5) target bundleno = 389 (0x185), region = 32  ;;  %s391_s21 = sshll.u32 (!%p175_p5), %s782_s20, 5 }
  0x39   : > { %s181_s5 = scalar_lea.sflag (!%p175_p5), [#allocation3], %s782_s20  ;;  %s184_s29 = scalar_lea.vmem (!%p175_p5), [#allocation2], %s391_s21 }
  0x3f   : > { %586 = dma.done.wait (%p715_p8), %s181_s5, 512  }
  0x40   : > { %588 = vsyncadd (%p715_p8), %s181_s5, 4294966784  ;;  %v207_v0 = vld [vmem:[%s184_s29] sm:$0xff]  ;;  %v208_v1 = vld [vmem:[%s184_s29 + $0x10] sm:$0xff]  ;;  %v629_v12 = vmov 0   ;;  %s395_s27 = sshll.u32 %s607_s15, 3  ;;  %s401_s8 = sshll.u32 %s607_s15, 1 }
  0x41   : > { %v393_v2 = vld [vmem:[%s184_s29 + $0x8] sm:$0xff]  ;;  %v209_v3 = vadd.f32 %v208_v1, %v207_v0  ;;  %v210_v4 = vmul.f32 %v207_v0, %v207_v0  ;;  %v211_v5 = vmul.f32 %v208_v1, %v208_v1  ;;  %v394_v6 = vld [vmem:[%s184_s29 + $0x18] sm:$0xff]  ;;  %491 = vset.pattern.permute.xlu0 %v629_v12  ;;  %492 = vset.pattern.permute.xlu1 %v629_v12  ;;  %s240_s24 = scalar_lea.vmem %s863_s1, %s395_s27  ;;  %s242_s26 = scalar_lea.vmem %s864_s2, %s395_s27 }
  0x42   : > { %v223_v7 = vmul.f32 %v393_v2, %v393_v2  ;;  %v224_v8 = vmul.f32 %v394_v6, %v394_v6  ;;  %v222_v10 = vadd.f32 %v394_v6, %v393_v2  ;;  %v241_v25 = vld [vmem:[%s240_s24] sm:$0xff]  ;;  %s402_s9 = sshll.u32 %s611_s16, 3  ;;  %s206_s5 = scalar_lea.vmem [#allocation5], %s391_s21 }
  0x43   : > { %213 = vadd.xlane.f32.xlu0 %v209_v3  ;;  %v212_v9 = vadd.f32 %v211_v5, %v210_v4  ;;  %v243_v28 = vld [vmem:[%s242_s26] sm:$0xff]  ;;  %s285_s10 = sadd.s32 %s402_s9, %s401_s8  ;;  %s288_s29 = sshll.u32 %s206_s5, 4  ;;  %s803_s29 = int_to_ptr.vmem [resolvable:$true] %s288_s29 }
  0x44   : > { %v225_v11 = vadd.f32 %v224_v8, %v223_v7  ;;  %s403_s11 = sshll.u32 %s285_s10, 7  ;;  %s273_s21 = scalar_lea.sflag [#allocation4], %s782_s20 }
  0x45   : > { %216 = vadd.xlane.f32.xlu1 %v212_v9  ;;  %s808_s16 = scalar_lea.hbm %s865_s3, %s403_s11  ;;  %s525_s25 = scalar_lea.vmem %s803_s29, 512 }
  0x46   : > { %p526_p8 = scmp.ne.s32.totalorder %s803_s29, %s525_s25  ;;  %p873_p9 = scmp.ne.s32.totalorder %s869_s28, 0 }
  0x47   : > { %226 = vadd.xlane.f32.xlu0 %v222_v10  ;;  %s630_s24 = smov [#allocation5]  }
  0x48   : > { %p527_p12 = pnand %p526_p8, %p873_p9  ;;  %s529_s7 = sshll.u32 %s630_s24, 4  ;;  %s530_s7 = int_to_ptr.vmem [resolvable:$false] %s529_s7 }
  0x49   : > { %229 = vadd.xlane.f32.xlu1 %v225_v11  ;;  %s531_s30 = scalar_lea.vmem %s530_s7, 1024  ;;  %p532_p11 = scmp.lt.s32.totalorder %s803_s29, %s530_s7 }
  0x4a   : > { %p528_p0 = pneg %p527_p12  ;;  %p533_p13 = scmp.lt.s32.totalorder %s531_s30, %s525_s25 }
  0x4c   : > { %p534_p2 = por %p533_p13, %p532_p11 }
  0x4e   : > { %p535_p4 = pnand %p534_p2, %p528_p0 }
  0xd0   : > { %v214_v13 = vpop.xlane.xlu0 %213 }
  0xd2   : > { %v217_v14 = vpop.xlane.xlu1 %216 }
  0xd4   : > { %v227_v15 = vpop.xlane.xlu0 %226 }
  0xd5   : > { %v228_v16 = vadd.f32 %v227_v15, %v214_v13 }
  0xd6   : > { %v230_v17 = vpop.xlane.xlu1 %229 }
  0xd7   : > { %v232_v18 = vmul.f32 0.001953125, %v228_v16  ;;  %v231_v19 = vadd.f32 %v230_v17, %v217_v14 }
  0xd9   : > { %v234_v20 = vmul.f32 %v232_v18, %v232_v18  ;;  %v233_v21 = vmul.f32 0.001953125, %v231_v19 }
  0xdb   : > { %v235_v22 = vsub.f32 %v233_v21, %v234_v20 }
  0xdd   : > { %v236_v23 = vmax.f32 %v235_v22, 0.0 }
  0xdf   : > { %v237_v24 = vadd.f32 1e-05, %v236_v23 }
  0xe1   : > { %493 = vrsqrt.f32 %v237_v24 }
  0xeb   : > { %v494_v26 = vpop.eup %493 }
  0xec   : > { %v244_v27 = vmul.f32 %v494_v26, %v241_v25 }
  0xee   : > { %249 = vperm.xlu0 %491, %v244_v27   ;;  %v245_v29 = vmul.f32 %v244_v27, %v232_v18 }
  0xf0   : > { %v246_v30 = vsub.f32 %v243_v28, %v245_v29 }
  0xf2   : > { %256 = vperm.xlu1 %492, %v246_v30  }
 0x16d   : > { %v250_v31 = vpop.permute.xlu0 %249 }
 0x16e   : > { %v252_v32 = vmul.f32 %v250_v31, %v207_v0  ;;  %v253_v33 = vmul.f32 %v250_v31, %v208_v1  ;;  %v265_v34 = vmul.f32 %v393_v2, %v250_v31  ;;  %v266_v35 = vmul.f32 %v394_v6, %v250_v31 }
 0x171   : > { %v257_v36 = vpop.permute.xlu1 %256 }
 0x172   : > { %v259_v37 = vadd.f32 %v257_v36, %v252_v32  ;;  %v260_v38 = vadd.f32 %v257_v36, %v253_v33  ;;  %v267_v39 = vadd.f32 %v265_v34, %v257_v36  ;;  %v268_v40 = vadd.f32 %v266_v35, %v257_v36 }
 0x174   : > { %261 = vst [vmem:[%s206_s5] sm:$0xff] %v259_v37  ;;  %262 = vst [vmem:[%s206_s5 + $0x10] sm:$0xff] %v260_v38 }
 0x175   : > { %398 = vst [vmem:[%s206_s5 + $0x8] sm:$0xff] %v267_v39  ;;  %399 = vst [vmem:[%s206_s5 + $0x18] sm:$0xff] %v268_v40 }
 0x176   : > { %538 = shalt.err (!%p535_p4)
}
 0x177   : > { %s539_s26 = scalar_lea.hbm %s808_s16, 512  ;;  %s543_s10 = scalar_lea.hbm %s865_s3, 2048 }
 0x178   : > { %p540_p6 = scmp.ne.s32.totalorder %s808_s16, %s539_s26  ;;  %p544_p1 = scmp.lt.u32.totalorder %s808_s16, %s865_s3 }
 0x179   : > { %p545_p3 = scmp.lt.u32.totalorder %s543_s10, %s539_s26  ;;  %p547_p8 = scmp.lt.u32.totalorder %s539_s26, %s808_s16 }
 0x17a   : > { %p541_p7 = pnand %p540_p6, %p873_p9 }
 0x17b   : > { %p546_p5 = por %p545_p3, %p544_p1 }
 0x17c   : > { %p542_p10 = pneg %p541_p7 }
 0x17d   : > { %p548_p12 = por %p547_p8, %p546_p5 }
 0x17f   : > { %p549_p0 = pnand %p548_p12, %p542_p10 }
 0x181   : > { %552 = shalt.err (!%p549_p0)
}
 0x182   : > { %s631_s27 = smov 256   ;;  %s632_s15 = smov 512  }
 0x183   : > { %s633_s25 = smov 16  }
 0x184   : > { %408 = dma.vmem_to_hbm [thread:$0]  (%p873_p9), %s803_s29, 512, %s808_s16, %s273_s21, %s631_s27, %s632_s15, %s633_s25  }
 0x185 PF: > { %p419_p11 = scmp.ge.s32.totalorder %s623_s19, 2  ;;  %s303_s24 = sand.u32 1, %s595_s12  }
 0x186   : > { %p874_p13 = scmp.ne.s32.totalorder %s870_s4, 0  ;;  %s304_s7 = scalar_lea.sflag [#allocation4], %s303_s24 }
 0x188   : > { %p415_p2 = pnand %p419_p11, %p874_p13 }
 0x18a   : > { %590 = dma.done.wait (!%p415_p2), %s304_s7, 512  }
 0x18b   : > { %592 = vsyncadd (!%p415_p2), %s304_s7, 4294966784  ;;  %s19_s19 = sadd.s32 1, %s623_s19   ;;  %s875_s12 = smov %s599_s13 }
 0x18c   : > { %p16_p4 = scmp.ge.s32.totalorder %s19_s19, 6   ;;  %s876_s13 = smov %s603_s14 }
 0x18d   : > { %s877_s14 = smov %s732_s6  ;;  %s878_s15 = smov %s615_s17 }
 0x18e   : > { %s879_s16 = smov %s619_s18  ;;  %s880_s17 = smov %s883_s22 }
 0x18f   : > { %s881_s18 = smov %s887_s23  ;;  %18 = sbr.rel (!%p16_p4) target bundleno = 7 (0x7), region = 81 }
 0x196   :  { %309 = vsyncpa [#allocation3], 1 }
 0x197   :  { %311 = vsyncpa [#allocation3 + $0x1], 1 }
 0x198   :  { %312 = vsyncpa [#allocation4], 1 }
 0x199   :  { %314 = vsyncpa [#allocation4 + $0x1], 1 }

</bundles_post_ra>
